<compile_context>
chip_gen: v5e
topology: v5e:2x2
jax: 0.10.0
libtpu: 0.0.40
codegen_flags: <defaults>
</compile_context>

<pallas_src>
import functools

import jax
import jax.numpy as jnp
from jax.experimental import pallas as pl
from jax.experimental.pallas import tpu as pltpu


def _round_up(v, m):
    return (v + m - 1) // m * m


# ---------------------------------------------------------------------------------------
# Kernels
# ---------------------------------------------------------------------------------------
def _sft_kernel_vpu(x_ref, kp_ref, ws_ref, bs_ref, wh_ref, bh_ref, o_ref, *, channels):
    """Small-C path.

    x_ref/kp_ref/o_ref: (B_blk, C, TS, 128)  -- sublane = spatial sub-tile, lane = 128.
    ws_ref/wh_ref: (C, C) f32 in SMEM; bs_ref/bh_ref: (C,) f32 in SMEM.
    Each (co, c) weight is a scalar splat -> pure VPU broadcast-FMAs, no MXU, no XLU.
    """
    x = x_ref[...].astype(jnp.float32)
    kp = kp_ref[...].astype(jnp.float32)
    for co in range(channels):                      # unrolled at trace time (C static, <= 8)
        acc_s = None
        acc_h = None
        for c in range(channels):
            t = kp[:, c]                            # (B_blk, TS, 128)
            ps = t * ws_ref[co, c]
            ph = t * wh_ref[co, c]
            acc_s = ps if acc_s is None else acc_s + ps
            acc_h = ph if acc_h is None else acc_h + ph
        scale = acc_s + bs_ref[co]
        shift = acc_h + bh_ref[co]
        o_ref[:, co] = (x[:, co] * scale + shift).astype(o_ref.dtype)


def _sft_kernel_mxu(x_ref, kp_ref, ws_ref, bs_ref, wh_ref, bh_ref, o_ref):
    """Large-C path: two (C,C)@(C,TL) MXU matmuls (no fused-output slicing -> no copies)."""
    kp = kp_ref[0].astype(jnp.float32)              # (C, TL)
    x = x_ref[0].astype(jnp.float32)
    scale = jnp.dot(ws_ref[...], kp, preferred_element_type=jnp.float32,
                    precision=jax.lax.Precision.HIGHEST) + bs_ref[...]
    shift = jnp.dot(wh_ref[...], kp, preferred_element_type=jnp.float32,
                    precision=jax.lax.Precision.HIGHEST) + bh_ref[...]
    o_ref[0] = (x * scale + shift).astype(o_ref.dtype)


# ---------------------------------------------------------------------------------------
# Tiling planners
# ---------------------------------------------------------------------------------------
_TARGET_BLOCK_BYTES = 2 << 20     # ~2 MiB per array per step: >> per-step overhead,
_MAX_FULL_BLOCK_BYTES = 8 << 20   # well inside v7x's 64 MiB VMEM after double-buffering.


def _plan_small_c(N, C, L, itemsize):
    """Pick (Lp, S, B_blk, TS) for the 4-D (B_blk, C, TS, 128) blocking."""
    Lp = _round_up(L, 128)
    S = Lp // 128
    full_block = C * S * 128 * itemsize
    if S % 8 != 0 and full_block > _MAX_FULL_BLOCK_BYTES:
        # Pad further so the spatial sublane axis splits into 8-row tiles.
        Lp = _round_up(L, 1024)
        S = Lp // 128
        full_block = C * S * 128 * itemsize

    if S % 8 == 0 and full_block > _TARGET_BLOCK_BYTES:
        B_blk = 1
        max_ts = max(8, (_TARGET_BLOCK_BYTES // (C * 128 * itemsize)) // 8 * 8)
        TS = min(S, max_ts)
        while S % TS:
            TS -= 8
    else:
        # Whole image fits; pack several images per step so per-step payload isn't tiny.
        TS = S
        B_blk = max(1, min(N, _TARGET_BLOCK_BYTES // max(full_block, 1)))
        while N % B_blk:
            B_blk -= 1

    # Prefer >= 4 grid steps (v7x shards parallel axes across 2 TCs; each TC needs >= 2
    # steps to hide pipeline prologue/epilogue).  Only when we have slack to give back.
    def nsteps(b, t):
        return (N // b) * (S // t)

    while B_blk > 1 and nsteps(B_blk, TS) < 4:
        B_blk -= 1
        while N % B_blk:
            B_blk -= 1
    if S % 8 == 0:
        while TS > 8 and TS % 16 == 0 and S % (TS // 2) == 0 and nsteps(B_blk, TS) < 4:
            TS //= 2
    return Lp, S, B_blk, TS


def _plan_mxu(N, C, L, itemsize):
    """Pick (Lp, TL) for the 3-D (1, C, TL) blocking."""
    Lp = _round_up(L, 128)
    sub = 8 if itemsize >= 4 else 16
    c_pad = _round_up(C, sub)
    max_tl = max(128, (_TARGET_BLOCK_BYTES // (c_pad * itemsize)) // 128 * 128)
    TL = min(Lp, max_tl)
    while Lp % TL:
        TL -= 128

    def nsteps(t):
        return N * (Lp // t)

    while TL > 128 and TL % 256 == 0 and nsteps(TL) < 4:
        TL //= 2
    return Lp, TL


# ---------------------------------------------------------------------------------------
# Wrapper
# ---------------------------------------------------------------------------------------
def sft_layer(x, kernel_params, w_scale, b_scale, w_shift, b_shift):
    """SFTLayer forward: x * conv1x1_scale(kp) + conv1x1_shift(kp).  NCHW in/out.

    w_scale/w_shift: (C_out, C_in) squeezed 1x1-conv weights; b_scale/b_shift: (C_out,).
    x / kernel_params may be f32 or bf16 (bf16 I/O recommended on v5e for ~2x bandwidth);
    internal math is always f32 and the output matches x.dtype.
    """
    N, C, H, W = x.shape
    L = H * W
    itemsize = jnp.dtype(x.dtype).itemsize

    x3 = x.reshape(N, C, L)
    kp3 = kernel_params.reshape(N, C, L)

    ws = w_scale.astype(jnp.float32)
    wh = w_shift.astype(jnp.float32)
    bs = b_scale.astype(jnp.float32)
    bh = b_shift.astype(jnp.float32)

    if C <= 8:
        # ------------------------- VPU path (small C) -------------------------
        Lp, S, B_blk, TS = _plan_small_c(N, C, L, itemsize)
        if Lp != L:
            pad = Lp - L
            x3 = jnp.pad(x3, ((0, 0), (0, 0), (0, pad)))
            kp3 = jnp.pad(kp3, ((0, 0), (0, 0), (0, pad)))
        x4 = x3.reshape(N, C, S, 128)
        kp4 = kp3.reshape(N, C, S, 128)

        data_spec = pl.BlockSpec((B_blk, C, TS, 128), lambda n, l: (n, 0, l, 0))
        smem_spec = pl.BlockSpec(memory_space=pltpu.MemorySpace.SMEM)
        grid = (N // B_blk, S // TS)

        sub = 8 if itemsize >= 4 else 16
        ts_pad = _round_up(TS, sub)
        block_bytes = B_blk * C * ts_pad * 128 * itemsize          # sublane-padded block
        interm_bytes = 4 * B_blk * C * _round_up(TS, 8) * 128 * 4  # f32 upcasts + accums
        vmem_need = 2 * 3 * block_bytes + interm_bytes

        kernel = functools.partial(_sft_kernel_vpu, channels=C)
        in_specs = [data_spec, data_spec, smem_spec, smem_spec, smem_spec, smem_spec]
        operands = (x4, kp4, ws, bs, wh, bh)
        out_shape = jax.ShapeDtypeStruct((N, C, S, 128), x.dtype)
        out_spec = pl.BlockSpec((B_blk, C, TS, 128), lambda n, l: (n, 0, l, 0))
    else:
        # ------------------------- MXU path (larger C) ------------------------
        Lp, TL = _plan_mxu(N, C, L, itemsize)
        if Lp != L:
            pad = Lp - L
            x3 = jnp.pad(x3, ((0, 0), (0, 0), (0, pad)))
            kp3 = jnp.pad(kp3, ((0, 0), (0, 0), (0, pad)))

        data_spec = pl.BlockSpec((1, C, TL), lambda n, l: (n, 0, l))
        grid = (N, Lp // TL)

        sub = 8 if itemsize >= 4 else 16
        c_pad_io = _round_up(C, sub)
        c_pad32 = _round_up(C, 8)
        block_bytes = c_pad_io * TL * itemsize                     # sublane-padded block
        interm_bytes = 4 * c_pad32 * TL * 4                        # kp/x f32 + scale/shift
        weight_bytes = 2 * (c_pad32 * _round_up(C, 128) + c_pad32 * 128) * 4
        vmem_need = 2 * 3 * block_bytes + interm_bytes + weight_bytes

        kernel = _sft_kernel_mxu
        in_specs = [
            data_spec,
            data_spec,
            pl.BlockSpec((C, C), lambda n, l: (0, 0)),   # scale weight (resident)
            pl.BlockSpec((C, 1), lambda n, l: (0, 0)),   # scale bias
            pl.BlockSpec((C, C), lambda n, l: (0, 0)),   # shift weight (resident)
            pl.BlockSpec((C, 1), lambda n, l: (0, 0)),   # shift bias
        ]
        operands = (x3, kp3, ws, bs.reshape(C, 1), wh, bh.reshape(C, 1))
        out_shape = jax.ShapeDtypeStruct((N, C, Lp), x.dtype)
        out_spec = pl.BlockSpec((1, C, TL), lambda n, l: (n, 0, l))

    # Scoped-VMEM limit: padded need + headroom, capped ~40 MiB (v7x has 64 MiB physical).
    vmem_limit = int(max(16 << 20, min(40 << 20, int(1.3 * vmem_need)), int(1.2 * vmem_need)))

    out = pl.pallas_call(
        kernel,
        out_shape=out_shape,
        grid_spec=pltpu.PrefetchScalarGridSpec(
            num_scalar_prefetch=0,
            grid=grid,
            in_specs=in_specs,
            out_specs=out_spec,
        ),
        compiler_params=pltpu.CompilerParams(
            dimension_semantics=("parallel", "parallel"),
            vmem_limit_bytes=vmem_limit,
        ),
    )(*operands)

    out = out.reshape(N, C, -1)
    if out.shape[-1] != L:
        out = out[:, :, :L]
    return out.reshape(N, C, H, W)


if __name__ == "__main__":
    N, C, H, W = 2, 4, 16, 16

    key = jax.random.PRNGKey(0)
    kx, kp_key, kws, kbs, kwh, kbh = jax.random.split(key, 6)

    x = jax.random.normal(kx, (N, C, H, W), dtype=jnp.float32)
    kernel_params = jax.random.normal(kp_key, (N, C, H, W), dtype=jnp.float32)

    # 1x1 conv parameters: weight (C_out, C_in), bias (C_out,)
    w_scale = 0.1 * jax.random.normal(kws, (C, C), dtype=jnp.float32)
    b_scale = 0.1 * jax.random.normal(kbs, (C,), dtype=jnp.float32)
    w_shift = 0.1 * jax.random.normal(kwh, (C, C), dtype=jnp.float32)
    b_shift = 0.1 * jax.random.normal(kbh, (C,), dtype=jnp.float32)

    out = sft_layer(x, kernel_params, w_scale, b_scale, w_shift, b_shift)
    out = jax.block_until_ready(out)

    # Pure-JAX reference at HIGHEST precision (matches the PyTorch f32 module).
    scale_ref = jnp.einsum("oc,nchw->nohw", w_scale, kernel_params,
                           precision=jax.lax.Precision.HIGHEST) + b_scale[None, :, None, None]
    shift_ref = jnp.einsum("oc,nchw->nohw", w_shift, kernel_params,
                           precision=jax.lax.Precision.HIGHEST) + b_shift[None, :, None, None]
    ref = x * scale_ref + shift_ref

    assert out.shape == (N, C, H, W)
    assert jnp.allclose(out, ref, atol=2e-5, rtol=2e-5), "mismatch vs reference"

    print("KERNEL_OK")
</pallas_src>

<mosaic_0001>
module attributes {stable_mosaic.version = 11 : i64} {
  func.func @_sft_kernel_vpu(%arg0: i32, %arg1: i32, %arg2: memref<1x4x2x128xf32, #tpu.memory_space<vmem>>, %arg3: memref<1x4x2x128xf32, #tpu.memory_space<vmem>>, %arg4: memref<4x4xf32, #tpu.memory_space<smem>>, %arg5: memref<4xf32, #tpu.memory_space<smem>>, %arg6: memref<4x4xf32, #tpu.memory_space<smem>>, %arg7: memref<4xf32, #tpu.memory_space<smem>>, %arg8: memref<1x4x2x128xf32, #tpu.memory_space<vmem>>) attributes {dimension_semantics = [#tpu.dimension_semantics<parallel>, #tpu.dimension_semantics<parallel>], iteration_bounds = array<i64: 2, 1>, scalar_prefetch = 0 : i64, scratch_operands = 0 : i64, tpu.core_type = #tpu.core_type<tc>, window_params = [{transform_indices = @transform_0, window_bounds = array<i64: 1, 4, 2, 128>}, {transform_indices = @transform_1, window_bounds = array<i64: 1, 4, 2, 128>}, {transform_indices = @transform_2, window_bounds = array<i64: 4, 4>}, {transform_indices = @transform_3, window_bounds = array<i64: 4>}, {transform_indices = @transform_4, window_bounds = array<i64: 4, 4>}, {transform_indices = @transform_5, window_bounds = array<i64: 4>}, {transform_indices = @transform_6, window_bounds = array<i64: 1, 4, 2, 128>}]} {
    %c0 = arith.constant 0 : index
    %c0_0 = arith.constant 0 : index
    %c0_1 = arith.constant 0 : index
    %c0_2 = arith.constant 0 : index
    %0 = vector.load %arg2[%c0, %c0_0, %c0_1, %c0_2] : memref<1x4x2x128xf32, #tpu.memory_space<vmem>>, vector<1x4x2x128xf32>
    %c0_3 = arith.constant 0 : index
    %c0_4 = arith.constant 0 : index
    %c0_5 = arith.constant 0 : index
    %c0_6 = arith.constant 0 : index
    %1 = vector.load %arg3[%c0_3, %c0_4, %c0_5, %c0_6] : memref<1x4x2x128xf32, #tpu.memory_space<vmem>>, vector<1x4x2x128xf32>
    %2 = vector.extract_strided_slice %1 {offsets = [0, 0, 0, 0], sizes = [1, 1, 2, 128], strides = [1, 1, 1, 1]} : vector<1x4x2x128xf32> to vector<1x1x2x128xf32>
    %3 = vector.shape_cast %2 : vector<1x1x2x128xf32> to vector<1x2x128xf32>
    %c0_7 = arith.constant 0 : index
    %c0_8 = arith.constant 0 : index
    %4 = memref.load %arg4[%c0_7, %c0_8] : memref<4x4xf32, #tpu.memory_space<smem>>
    %5 = vector.broadcast %4 : f32 to vector<1x2x128xf32>
    %6 = arith.mulf %3, %5 : vector<1x2x128xf32>
    %c0_9 = arith.constant 0 : index
    %c0_10 = arith.constant 0 : index
    %7 = memref.load %arg6[%c0_9, %c0_10] : memref<4x4xf32, #tpu.memory_space<smem>>
    %8 = vector.broadcast %7 : f32 to vector<1x2x128xf32>
    %9 = arith.mulf %3, %8 : vector<1x2x128xf32>
    %10 = vector.extract_strided_slice %1 {offsets = [0, 1, 0, 0], sizes = [1, 1, 2, 128], strides = [1, 1, 1, 1]} : vector<1x4x2x128xf32> to vector<1x1x2x128xf32>
    %11 = vector.shape_cast %10 : vector<1x1x2x128xf32> to vector<1x2x128xf32>
    %c0_11 = arith.constant 0 : index
    %c1 = arith.constant 1 : index
    %12 = memref.load %arg4[%c0_11, %c1] : memref<4x4xf32, #tpu.memory_space<smem>>
    %13 = vector.broadcast %12 : f32 to vector<1x2x128xf32>
    %14 = arith.mulf %11, %13 : vector<1x2x128xf32>
    %c0_12 = arith.constant 0 : index
    %c1_13 = arith.constant 1 : index
    %15 = memref.load %arg6[%c0_12, %c1_13] : memref<4x4xf32, #tpu.memory_space<smem>>
    %16 = vector.broadcast %15 : f32 to vector<1x2x128xf32>
    %17 = arith.mulf %11, %16 : vector<1x2x128xf32>
    %18 = arith.addf %6, %14 : vector<1x2x128xf32>
    %19 = arith.addf %9, %17 : vector<1x2x128xf32>
    %20 = vector.extract_strided_slice %1 {offsets = [0, 2, 0, 0], sizes = [1, 1, 2, 128], strides = [1, 1, 1, 1]} : vector<1x4x2x128xf32> to vector<1x1x2x128xf32>
    %21 = vector.shape_cast %20 : vector<1x1x2x128xf32> to vector<1x2x128xf32>
    %c0_14 = arith.constant 0 : index
    %c2 = arith.constant 2 : index
    %22 = memref.load %arg4[%c0_14, %c2] : memref<4x4xf32, #tpu.memory_space<smem>>
    %23 = vector.broadcast %22 : f32 to vector<1x2x128xf32>
    %24 = arith.mulf %21, %23 : vector<1x2x128xf32>
    %c0_15 = arith.constant 0 : index
    %c2_16 = arith.constant 2 : index
    %25 = memref.load %arg6[%c0_15, %c2_16] : memref<4x4xf32, #tpu.memory_space<smem>>
    %26 = vector.broadcast %25 : f32 to vector<1x2x128xf32>
    %27 = arith.mulf %21, %26 : vector<1x2x128xf32>
    %28 = arith.addf %18, %24 : vector<1x2x128xf32>
    %29 = arith.addf %19, %27 : vector<1x2x128xf32>
    %30 = vector.extract_strided_slice %1 {offsets = [0, 3, 0, 0], sizes = [1, 1, 2, 128], strides = [1, 1, 1, 1]} : vector<1x4x2x128xf32> to vector<1x1x2x128xf32>
    %31 = vector.shape_cast %30 : vector<1x1x2x128xf32> to vector<1x2x128xf32>
    %c0_17 = arith.constant 0 : index
    %c3 = arith.constant 3 : index
    %32 = memref.load %arg4[%c0_17, %c3] : memref<4x4xf32, #tpu.memory_space<smem>>
    %33 = vector.broadcast %32 : f32 to vector<1x2x128xf32>
    %34 = arith.mulf %31, %33 : vector<1x2x128xf32>
    %c0_18 = arith.constant 0 : index
    %c3_19 = arith.constant 3 : index
    %35 = memref.load %arg6[%c0_18, %c3_19] : memref<4x4xf32, #tpu.memory_space<smem>>
    %36 = vector.broadcast %35 : f32 to vector<1x2x128xf32>
    %37 = arith.mulf %31, %36 : vector<1x2x128xf32>
    %38 = arith.addf %28, %34 : vector<1x2x128xf32>
    %39 = arith.addf %29, %37 : vector<1x2x128xf32>
    %c0_20 = arith.constant 0 : index
    %40 = memref.load %arg5[%c0_20] : memref<4xf32, #tpu.memory_space<smem>>
    %41 = vector.broadcast %40 : f32 to vector<1x2x128xf32>
    %42 = arith.addf %38, %41 : vector<1x2x128xf32>
    %c0_21 = arith.constant 0 : index
    %43 = memref.load %arg7[%c0_21] : memref<4xf32, #tpu.memory_space<smem>>
    %44 = vector.broadcast %43 : f32 to vector<1x2x128xf32>
    %45 = arith.addf %39, %44 : vector<1x2x128xf32>
    %46 = vector.extract_strided_slice %0 {offsets = [0, 0, 0, 0], sizes = [1, 1, 2, 128], strides = [1, 1, 1, 1]} : vector<1x4x2x128xf32> to vector<1x1x2x128xf32>
    %47 = vector.shape_cast %46 : vector<1x1x2x128xf32> to vector<1x2x128xf32>
    %48 = arith.mulf %47, %42 : vector<1x2x128xf32>
    %49 = arith.addf %48, %45 : vector<1x2x128xf32>
    %c0_22 = arith.constant 0 : index
    %c0_23 = arith.constant 0 : index
    %c0_24 = arith.constant 0 : index
    %c0_25 = arith.constant 0 : index
    %50 = vector.load %arg8[%c0_22, %c0_23, %c0_24, %c0_25] : memref<1x4x2x128xf32, #tpu.memory_space<vmem>>, vector<1x1x2x128xf32>
    %51 = vector.shape_cast %50 : vector<1x1x2x128xf32> to vector<1x2x128xf32>
    %52 = vector.shape_cast %49 : vector<1x2x128xf32> to vector<1x1x2x128xf32>
    tpu.vector_store %arg8[%c0_22, %c0_23, %c0_24, %c0_25], %52 {strides = array<i32>} : memref<1x4x2x128xf32, #tpu.memory_space<vmem>>, vector<1x1x2x128xf32>,
    %53 = vector.extract_strided_slice %1 {offsets = [0, 0, 0, 0], sizes = [1, 1, 2, 128], strides = [1, 1, 1, 1]} : vector<1x4x2x128xf32> to vector<1x1x2x128xf32>
    %54 = vector.shape_cast %53 : vector<1x1x2x128xf32> to vector<1x2x128xf32>
    %c1_26 = arith.constant 1 : index
    %c0_27 = arith.constant 0 : index
    %55 = memref.load %arg4[%c1_26, %c0_27] : memref<4x4xf32, #tpu.memory_space<smem>>
    %56 = vector.broadcast %55 : f32 to vector<1x2x128xf32>
    %57 = arith.mulf %54, %56 : vector<1x2x128xf32>
    %c1_28 = arith.constant 1 : index
    %c0_29 = arith.constant 0 : index
    %58 = memref.load %arg6[%c1_28, %c0_29] : memref<4x4xf32, #tpu.memory_space<smem>>
    %59 = vector.broadcast %58 : f32 to vector<1x2x128xf32>
    %60 = arith.mulf %54, %59 : vector<1x2x128xf32>
    %61 = vector.extract_strided_slice %1 {offsets = [0, 1, 0, 0], sizes = [1, 1, 2, 128], strides = [1, 1, 1, 1]} : vector<1x4x2x128xf32> to vector<1x1x2x128xf32>
    %62 = vector.shape_cast %61 : vector<1x1x2x128xf32> to vector<1x2x128xf32>
    %c1_30 = arith.constant 1 : index
    %c1_31 = arith.constant 1 : index
    %63 = memref.load %arg4[%c1_30, %c1_31] : memref<4x4xf32, #tpu.memory_space<smem>>
    %64 = vector.broadcast %63 : f32 to vector<1x2x128xf32>
    %65 = arith.mulf %62, %64 : vector<1x2x128xf32>
    %c1_32 = arith.constant 1 : index
    %c1_33 = arith.constant 1 : index
    %66 = memref.load %arg6[%c1_32, %c1_33] : memref<4x4xf32, #tpu.memory_space<smem>>
    %67 = vector.broadcast %66 : f32 to vector<1x2x128xf32>
    %68 = arith.mulf %62, %67 : vector<1x2x128xf32>
    %69 = arith.addf %57, %65 : vector<1x2x128xf32>
    %70 = arith.addf %60, %68 : vector<1x2x128xf32>
    %71 = vector.extract_strided_slice %1 {offsets = [0, 2, 0, 0], sizes = [1, 1, 2, 128], strides = [1, 1, 1, 1]} : vector<1x4x2x128xf32> to vector<1x1x2x128xf32>
    %72 = vector.shape_cast %71 : vector<1x1x2x128xf32> to vector<1x2x128xf32>
    %c1_34 = arith.constant 1 : index
    %c2_35 = arith.constant 2 : index
    %73 = memref.load %arg4[%c1_34, %c2_35] : memref<4x4xf32, #tpu.memory_space<smem>>
    %74 = vector.broadcast %73 : f32 to vector<1x2x128xf32>
    %75 = arith.mulf %72, %74 : vector<1x2x128xf32>
    %c1_36 = arith.constant 1 : index
    %c2_37 = arith.constant 2 : index
    %76 = memref.load %arg6[%c1_36, %c2_37] : memref<4x4xf32, #tpu.memory_space<smem>>
    %77 = vector.broadcast %76 : f32 to vector<1x2x128xf32>
    %78 = arith.mulf %72, %77 : vector<1x2x128xf32>
    %79 = arith.addf %69, %75 : vector<1x2x128xf32>
    %80 = arith.addf %70, %78 : vector<1x2x128xf32>
    %81 = vector.extract_strided_slice %1 {offsets = [0, 3, 0, 0], sizes = [1, 1, 2, 128], strides = [1, 1, 1, 1]} : vector<1x4x2x128xf32> to vector<1x1x2x128xf32>
    %82 = vector.shape_cast %81 : vector<1x1x2x128xf32> to vector<1x2x128xf32>
    %c1_38 = arith.constant 1 : index
    %c3_39 = arith.constant 3 : index
    %83 = memref.load %arg4[%c1_38, %c3_39] : memref<4x4xf32, #tpu.memory_space<smem>>
    %84 = vector.broadcast %83 : f32 to vector<1x2x128xf32>
    %85 = arith.mulf %82, %84 : vector<1x2x128xf32>
    %c1_40 = arith.constant 1 : index
    %c3_41 = arith.constant 3 : index
    %86 = memref.load %arg6[%c1_40, %c3_41] : memref<4x4xf32, #tpu.memory_space<smem>>
    %87 = vector.broadcast %86 : f32 to vector<1x2x128xf32>
    %88 = arith.mulf %82, %87 : vector<1x2x128xf32>
    %89 = arith.addf %79, %85 : vector<1x2x128xf32>
    %90 = arith.addf %80, %88 : vector<1x2x128xf32>
    %c1_42 = arith.constant 1 : index
    %91 = memref.load %arg5[%c1_42] : memref<4xf32, #tpu.memory_space<smem>>
    %92 = vector.broadcast %91 : f32 to vector<1x2x128xf32>
    %93 = arith.addf %89, %92 : vector<1x2x128xf32>
    %c1_43 = arith.constant 1 : index
    %94 = memref.load %arg7[%c1_43] : memref<4xf32, #tpu.memory_space<smem>>
    %95 = vector.broadcast %94 : f32 to vector<1x2x128xf32>
    %96 = arith.addf %90, %95 : vector<1x2x128xf32>
    %97 = vector.extract_strided_slice %0 {offsets = [0, 1, 0, 0], sizes = [1, 1, 2, 128], strides = [1, 1, 1, 1]} : vector<1x4x2x128xf32> to vector<1x1x2x128xf32>
    %98 = vector.shape_cast %97 : vector<1x1x2x128xf32> to vector<1x2x128xf32>
    %99 = arith.mulf %98, %93 : vector<1x2x128xf32>
    %100 = arith.addf %99, %96 : vector<1x2x128xf32>
    %c0_44 = arith.constant 0 : index
    %c1_45 = arith.constant 1 : index
    %c0_46 = arith.constant 0 : index
    %c0_47 = arith.constant 0 : index
    %101 = vector.load %arg8[%c0_44, %c1_45, %c0_46, %c0_47] : memref<1x4x2x128xf32, #tpu.memory_space<vmem>>, vector<1x1x2x128xf32>
    %102 = vector.shape_cast %101 : vector<1x1x2x128xf32> to vector<1x2x128xf32>
    %103 = vector.shape_cast %100 : vector<1x2x128xf32> to vector<1x1x2x128xf32>
    tpu.vector_store %arg8[%c0_44, %c1_45, %c0_46, %c0_47], %103 {strides = array<i32>} : memref<1x4x2x128xf32, #tpu.memory_space<vmem>>, vector<1x1x2x128xf32>,
    %104 = vector.extract_strided_slice %1 {offsets = [0, 0, 0, 0], sizes = [1, 1, 2, 128], strides = [1, 1, 1, 1]} : vector<1x4x2x128xf32> to vector<1x1x2x128xf32>
    %105 = vector.shape_cast %104 : vector<1x1x2x128xf32> to vector<1x2x128xf32>
    %c2_48 = arith.constant 2 : index
    %c0_49 = arith.constant 0 : index
    %106 = memref.load %arg4[%c2_48, %c0_49] : memref<4x4xf32, #tpu.memory_space<smem>>
    %107 = vector.broadcast %106 : f32 to vector<1x2x128xf32>
    %108 = arith.mulf %105, %107 : vector<1x2x128xf32>
    %c2_50 = arith.constant 2 : index
    %c0_51 = arith.constant 0 : index
    %109 = memref.load %arg6[%c2_50, %c0_51] : memref<4x4xf32, #tpu.memory_space<smem>>
    %110 = vector.broadcast %109 : f32 to vector<1x2x128xf32>
    %111 = arith.mulf %105, %110 : vector<1x2x128xf32>
    %112 = vector.extract_strided_slice %1 {offsets = [0, 1, 0, 0], sizes = [1, 1, 2, 128], strides = [1, 1, 1, 1]} : vector<1x4x2x128xf32> to vector<1x1x2x128xf32>
    %113 = vector.shape_cast %112 : vector<1x1x2x128xf32> to vector<1x2x128xf32>
    %c2_52 = arith.constant 2 : index
    %c1_53 = arith.constant 1 : index
    %114 = memref.load %arg4[%c2_52, %c1_53] : memref<4x4xf32, #tpu.memory_space<smem>>
    %115 = vector.broadcast %114 : f32 to vector<1x2x128xf32>
    %116 = arith.mulf %113, %115 : vector<1x2x128xf32>
    %c2_54 = arith.constant 2 : index
    %c1_55 = arith.constant 1 : index
    %117 = memref.load %arg6[%c2_54, %c1_55] : memref<4x4xf32, #tpu.memory_space<smem>>
    %118 = vector.broadcast %117 : f32 to vector<1x2x128xf32>
    %119 = arith.mulf %113, %118 : vector<1x2x128xf32>
    %120 = arith.addf %108, %116 : vector<1x2x128xf32>
    %121 = arith.addf %111, %119 : vector<1x2x128xf32>
    %122 = vector.extract_strided_slice %1 {offsets = [0, 2, 0, 0], sizes = [1, 1, 2, 128], strides = [1, 1, 1, 1]} : vector<1x4x2x128xf32> to vector<1x1x2x128xf32>
    %123 = vector.shape_cast %122 : vector<1x1x2x128xf32> to vector<1x2x128xf32>
    %c2_56 = arith.constant 2 : index
    %c2_57 = arith.constant 2 : index
    %124 = memref.load %arg4[%c2_56, %c2_57] : memref<4x4xf32, #tpu.memory_space<smem>>
    %125 = vector.broadcast %124 : f32 to vector<1x2x128xf32>
    %126 = arith.mulf %123, %125 : vector<1x2x128xf32>
    %c2_58 = arith.constant 2 : index
    %c2_59 = arith.constant 2 : index
    %127 = memref.load %arg6[%c2_58, %c2_59] : memref<4x4xf32, #tpu.memory_space<smem>>
    %128 = vector.broadcast %127 : f32 to vector<1x2x128xf32>
    %129 = arith.mulf %123, %128 : vector<1x2x128xf32>
    %130 = arith.addf %120, %126 : vector<1x2x128xf32>
    %131 = arith.addf %121, %129 : vector<1x2x128xf32>
    %132 = vector.extract_strided_slice %1 {offsets = [0, 3, 0, 0], sizes = [1, 1, 2, 128], strides = [1, 1, 1, 1]} : vector<1x4x2x128xf32> to vector<1x1x2x128xf32>
    %133 = vector.shape_cast %132 : vector<1x1x2x128xf32> to vector<1x2x128xf32>
    %c2_60 = arith.constant 2 : index
    %c3_61 = arith.constant 3 : index
    %134 = memref.load %arg4[%c2_60, %c3_61] : memref<4x4xf32, #tpu.memory_space<smem>>
    %135 = vector.broadcast %134 : f32 to vector<1x2x128xf32>
    %136 = arith.mulf %133, %135 : vector<1x2x128xf32>
    %c2_62 = arith.constant 2 : index
    %c3_63 = arith.constant 3 : index
    %137 = memref.load %arg6[%c2_62, %c3_63] : memref<4x4xf32, #tpu.memory_space<smem>>
    %138 = vector.broadcast %137 : f32 to vector<1x2x128xf32>
    %139 = arith.mulf %133, %138 : vector<1x2x128xf32>
    %140 = arith.addf %130, %136 : vector<1x2x128xf32>
    %141 = arith.addf %131, %139 : vector<1x2x128xf32>
    %c2_64 = arith.constant 2 : index
    %142 = memref.load %arg5[%c2_64] : memref<4xf32, #tpu.memory_space<smem>>
    %143 = vector.broadcast %142 : f32 to vector<1x2x128xf32>
    %144 = arith.addf %140, %143 : vector<1x2x128xf32>
    %c2_65 = arith.constant 2 : index
    %145 = memref.load %arg7[%c2_65] : memref<4xf32, #tpu.memory_space<smem>>
    %146 = vector.broadcast %145 : f32 to vector<1x2x128xf32>
    %147 = arith.addf %141, %146 : vector<1x2x128xf32>
    %148 = vector.extract_strided_slice %0 {offsets = [0, 2, 0, 0], sizes = [1, 1, 2, 128], strides = [1, 1, 1, 1]} : vector<1x4x2x128xf32> to vector<1x1x2x128xf32>
    %149 = vector.shape_cast %148 : vector<1x1x2x128xf32> to vector<1x2x128xf32>
    %150 = arith.mulf %149, %144 : vector<1x2x128xf32>
    %151 = arith.addf %150, %147 : vector<1x2x128xf32>
    %c0_66 = arith.constant 0 : index
    %c2_67 = arith.constant 2 : index
    %c0_68 = arith.constant 0 : index
    %c0_69 = arith.constant 0 : index
    %152 = vector.load %arg8[%c0_66, %c2_67, %c0_68, %c0_69] : memref<1x4x2x128xf32, #tpu.memory_space<vmem>>, vector<1x1x2x128xf32>
    %153 = vector.shape_cast %152 : vector<1x1x2x128xf32> to vector<1x2x128xf32>
    %154 = vector.shape_cast %151 : vector<1x2x128xf32> to vector<1x1x2x128xf32>
    tpu.vector_store %arg8[%c0_66, %c2_67, %c0_68, %c0_69], %154 {strides = array<i32>} : memref<1x4x2x128xf32, #tpu.memory_space<vmem>>, vector<1x1x2x128xf32>,
    %155 = vector.extract_strided_slice %1 {offsets = [0, 0, 0, 0], sizes = [1, 1, 2, 128], strides = [1, 1, 1, 1]} : vector<1x4x2x128xf32> to vector<1x1x2x128xf32>
    %156 = vector.shape_cast %155 : vector<1x1x2x128xf32> to vector<1x2x128xf32>
    %c3_70 = arith.constant 3 : index
    %c0_71 = arith.constant 0 : index
    %157 = memref.load %arg4[%c3_70, %c0_71] : memref<4x4xf32, #tpu.memory_space<smem>>
    %158 = vector.broadcast %157 : f32 to vector<1x2x128xf32>
    %159 = arith.mulf %156, %158 : vector<1x2x128xf32>
    %c3_72 = arith.constant 3 : index
    %c0_73 = arith.constant 0 : index
    %160 = memref.load %arg6[%c3_72, %c0_73] : memref<4x4xf32, #tpu.memory_space<smem>>
    %161 = vector.broadcast %160 : f32 to vector<1x2x128xf32>
    %162 = arith.mulf %156, %161 : vector<1x2x128xf32>
    %163 = vector.extract_strided_slice %1 {offsets = [0, 1, 0, 0], sizes = [1, 1, 2, 128], strides = [1, 1, 1, 1]} : vector<1x4x2x128xf32> to vector<1x1x2x128xf32>
    %164 = vector.shape_cast %163 : vector<1x1x2x128xf32> to vector<1x2x128xf32>
    %c3_74 = arith.constant 3 : index
    %c1_75 = arith.constant 1 : index
    %165 = memref.load %arg4[%c3_74, %c1_75] : memref<4x4xf32, #tpu.memory_space<smem>>
    %166 = vector.broadcast %165 : f32 to vector<1x2x128xf32>
    %167 = arith.mulf %164, %166 : vector<1x2x128xf32>
    %c3_76 = arith.constant 3 : index
    %c1_77 = arith.constant 1 : index
    %168 = memref.load %arg6[%c3_76, %c1_77] : memref<4x4xf32, #tpu.memory_space<smem>>
    %169 = vector.broadcast %168 : f32 to vector<1x2x128xf32>
    %170 = arith.mulf %164, %169 : vector<1x2x128xf32>
    %171 = arith.addf %159, %167 : vector<1x2x128xf32>
    %172 = arith.addf %162, %170 : vector<1x2x128xf32>
    %173 = vector.extract_strided_slice %1 {offsets = [0, 2, 0, 0], sizes = [1, 1, 2, 128], strides = [1, 1, 1, 1]} : vector<1x4x2x128xf32> to vector<1x1x2x128xf32>
    %174 = vector.shape_cast %173 : vector<1x1x2x128xf32> to vector<1x2x128xf32>
    %c3_78 = arith.constant 3 : index
    %c2_79 = arith.constant 2 : index
    %175 = memref.load %arg4[%c3_78, %c2_79] : memref<4x4xf32, #tpu.memory_space<smem>>
    %176 = vector.broadcast %175 : f32 to vector<1x2x128xf32>
    %177 = arith.mulf %174, %176 : vector<1x2x128xf32>
    %c3_80 = arith.constant 3 : index
    %c2_81 = arith.constant 2 : index
    %178 = memref.load %arg6[%c3_80, %c2_81] : memref<4x4xf32, #tpu.memory_space<smem>>
    %179 = vector.broadcast %178 : f32 to vector<1x2x128xf32>
    %180 = arith.mulf %174, %179 : vector<1x2x128xf32>
    %181 = arith.addf %171, %177 : vector<1x2x128xf32>
    %182 = arith.addf %172, %180 : vector<1x2x128xf32>
    %183 = vector.extract_strided_slice %1 {offsets = [0, 3, 0, 0], sizes = [1, 1, 2, 128], strides = [1, 1, 1, 1]} : vector<1x4x2x128xf32> to vector<1x1x2x128xf32>
    %184 = vector.shape_cast %183 : vector<1x1x2x128xf32> to vector<1x2x128xf32>
    %c3_82 = arith.constant 3 : index
    %c3_83 = arith.constant 3 : index
    %185 = memref.load %arg4[%c3_82, %c3_83] : memref<4x4xf32, #tpu.memory_space<smem>>
    %186 = vector.broadcast %185 : f32 to vector<1x2x128xf32>
    %187 = arith.mulf %184, %186 : vector<1x2x128xf32>
    %c3_84 = arith.constant 3 : index
    %c3_85 = arith.constant 3 : index
    %188 = memref.load %arg6[%c3_84, %c3_85] : memref<4x4xf32, #tpu.memory_space<smem>>
    %189 = vector.broadcast %188 : f32 to vector<1x2x128xf32>
    %190 = arith.mulf %184, %189 : vector<1x2x128xf32>
    %191 = arith.addf %181, %187 : vector<1x2x128xf32>
    %192 = arith.addf %182, %190 : vector<1x2x128xf32>
    %c3_86 = arith.constant 3 : index
    %193 = memref.load %arg5[%c3_86] : memref<4xf32, #tpu.memory_space<smem>>
    %194 = vector.broadcast %193 : f32 to vector<1x2x128xf32>
    %195 = arith.addf %191, %194 : vector<1x2x128xf32>
    %c3_87 = arith.constant 3 : index
    %196 = memref.load %arg7[%c3_87] : memref<4xf32, #tpu.memory_space<smem>>
    %197 = vector.broadcast %196 : f32 to vector<1x2x128xf32>
    %198 = arith.addf %192, %197 : vector<1x2x128xf32>
    %199 = vector.extract_strided_slice %0 {offsets = [0, 3, 0, 0], sizes = [1, 1, 2, 128], strides = [1, 1, 1, 1]} : vector<1x4x2x128xf32> to vector<1x1x2x128xf32>
    %200 = vector.shape_cast %199 : vector<1x1x2x128xf32> to vector<1x2x128xf32>
    %201 = arith.mulf %200, %195 : vector<1x2x128xf32>
    %202 = arith.addf %201, %198 : vector<1x2x128xf32>
    %c0_88 = arith.constant 0 : index
    %c3_89 = arith.constant 3 : index
    %c0_90 = arith.constant 0 : index
    %c0_91 = arith.constant 0 : index
    %203 = vector.load %arg8[%c0_88, %c3_89, %c0_90, %c0_91] : memref<1x4x2x128xf32, #tpu.memory_space<vmem>>, vector<1x1x2x128xf32>
    %204 = vector.shape_cast %203 : vector<1x1x2x128xf32> to vector<1x2x128xf32>
    %205 = vector.shape_cast %202 : vector<1x2x128xf32> to vector<1x1x2x128xf32>
    tpu.vector_store %arg8[%c0_88, %c3_89, %c0_90, %c0_91], %205 {strides = array<i32>} : memref<1x4x2x128xf32, #tpu.memory_space<vmem>>, vector<1x1x2x128xf32>,
    return
  }
  func.func @transform_0(%arg0: i32, %arg1: i32) -> (i32, i32, i32, i32) {
    %c0_i32 = arith.constant 0 : i32
    %c0_i32_0 = arith.constant 0 : i32
    %c0_i32_1 = arith.constant 0 : i32
    return %arg0, %c0_i32, %arg1, %c0_i32_0 : i32, i32, i32, i32
  }
  func.func @transform_1(%arg0: i32, %arg1: i32) -> (i32, i32, i32, i32) {
    %c0_i32 = arith.constant 0 : i32
    %c0_i32_0 = arith.constant 0 : i32
    %c0_i32_1 = arith.constant 0 : i32
    return %arg0, %c0_i32, %arg1, %c0_i32_0 : i32, i32, i32, i32
  }
  func.func @transform_2(%arg0: i32, %arg1: i32) -> (i32, i32) {
    %c0_i32 = arith.constant 0 : i32
    %c0_i32_0 = arith.constant 0 : i32
    %c0_i32_1 = arith.constant 0 : i32
    return %c0_i32, %c0_i32_0 : i32, i32
  }
  func.func @transform_3(%arg0: i32, %arg1: i32) -> i32 {
    %c0_i32 = arith.constant 0 : i32
    %c0_i32_0 = arith.constant 0 : i32
    return %c0_i32 : i32
  }
  func.func @transform_4(%arg0: i32, %arg1: i32) -> (i32, i32) {
    %c0_i32 = arith.constant 0 : i32
    %c0_i32_0 = arith.constant 0 : i32
    %c0_i32_1 = arith.constant 0 : i32
    return %c0_i32, %c0_i32_0 : i32, i32
  }
  func.func @transform_5(%arg0: i32, %arg1: i32) -> i32 {
    %c0_i32 = arith.constant 0 : i32
    %c0_i32_0 = arith.constant 0 : i32
    return %c0_i32 : i32
  }
  func.func @transform_6(%arg0: i32, %arg1: i32) -> (i32, i32, i32, i32) {
    %c0_i32 = arith.constant 0 : i32
    %c0_i32_0 = arith.constant 0 : i32
    %c0_i32_1 = arith.constant 0 : i32
    return %arg0, %c0_i32, %arg1, %c0_i32_0 : i32, i32, i32, i32
  }
}

</mosaic_0001>

<bundles_post_ra>
// kernel: tpu_custom_call.1
= control target key start
LH: loop header
LB: loop body
LE: loop exit
PB: predicated region body
PF: predicated region fallthrough
CT: control target
= control target key end

     0   :  { %s1435_s0 = inlined_call_operand.hbm [shape: f32[2,4,2,128], index: 0, kind: input, shape index: {}]   ;;  %s1436_s1 = inlined_call_operand.hbm [shape: f32[2,4,2,128], index: 1, kind: input, shape index: {}]   ;;  %s1437_s2 = inlined_call_operand.hbm [shape: f32[4,4], index: 2, kind: input, shape index: {}]   ;;  %s1438_s3 = inlined_call_operand.vmem [shape: f32[4], index: 3, kind: input, shape index: {}]   ;;  %s1439_s4 = inlined_call_operand.hbm [shape: f32[4,4], index: 4, kind: input, shape index: {}]   ;;  %s1440_s5 = inlined_call_operand.vmem [shape: f32[4], index: 5, kind: input, shape index: {}]   ;;  %s1441_s6 = inlined_call_operand.hbm [shape: f32[2,4,2,128], index: 6, kind: output, shape index: {}]  }
   0x1   :  { %1444 = sst [smem:[#allocation26_spill]] %s1437_s2 }
   0x2   :  { %1445 = sst [smem:[#allocation27_spill]] %s1438_s3 }
   0x3   :  { %1446 = sst [smem:[#allocation28_spill]] %s1439_s4 }
   0x4   :  { %1447 = sst [smem:[#allocation29_spill]] %s1440_s5 }
   0x5   :  { %11 = vsyncpa [#allocation3], 0 }
   0x6   :  { %13 = vsyncpa [#allocation3 + $0x1], 0 }
   0x7   :  { %14 = vsyncpa [#allocation8], 0 }
   0x8   :  { %16 = vsyncpa [#allocation8 + $0x1], 0 }
   0x9   :  { %17 = vsyncpa [#allocation5], 0 }
   0xa   :  { %18 = vsyncpa [#allocation6], 0 }
   0xb   :  { %19 = vsyncpa [#allocation12], 0 }
   0xc   :  { %20 = vsyncpa [#allocation14], 0 }
   0xd   :  { %21 = vsyncpa [#allocation4], 0 }
   0xe   :  { %23 = vsyncpa [#allocation4 + $0x1], 0  ;;  %s1173_s21 = smov 0   ;;  %s1175_s22 = smov 0  }
   0xf   :  { %s1177_s23 = smov 0   ;;  %s1179_s24 = smov 0  }
  0x10   :  { %s1181_s25 = smov 0   ;;  %s1183_s26 = smov 0  }
  0x11 LB: > { %1448 = sst [smem:[#allocation23_spill]] %s1124_s25  ;;  %s725_s27 = sadd.s32 4294967295, %s1128_s26   ;;  %s1128_s26 = sphi %s1183_s26, %s29_s26   ;;  %s1124_s25 = sphi %s1181_s25, %s1468_s25   ;;  %s1120_s24 = sphi %s1179_s24, %s1463_s24   ;;  %s1116_s23 = sphi %s1177_s23, %s1467_s23   ;;  %s1112_s22 = sphi %s1175_s22, %s1466_s22   ;;  %s1108_s21 = sphi %s1173_s21, %s1465_s21  }
  0x12   : > { %s726_s28 = sadd.s32 4294967294, %s1128_s26   ;;  %p63_p0 = scmp.ne.s32.totalorder %s1112_s22, %s1108_s21 }
  0x13   : > { %p1207_p1 = scmp.eq.s32.totalorder %s725_s27, 0  ;;  %p1211_p2 = scmp.eq.s32.totalorder %s725_s27, 1 }
  0x14   : > { %p207_p3 = scmp.eq.s32.totalorder %s726_s28, 1  ;;  %p727_p5 = scmp.ge.s32.totalorder %s1128_s26, 1 }
  0x15   : > { %p1217_p4 = por %p1207_p1, %p63_p0  ;;  %p214_p7 = scmp.lt.s32.totalorder %s1128_s26, 3 }
  0x16   : > { %p1222_p6 = por %p207_p3, %p63_p0  ;;  %s1453_s2 = sld [smem:[#allocation26_spill]] }
  0x17   : > { %p1230_p8 = pnand %p727_p5, %p214_p7  ;;  %p732_p9 = scmp.ge.s32.totalorder %s1128_s26, 2 }
  0x18   : > { %s1455_s3 = sld [smem:[#allocation27_spill]]  ;;  %s1130_s28 = smov [#allocation9]  }
  0x19   : > { %p816_p10 = pneg %p1230_p8  ;;  %s1456_s4 = sld [smem:[#allocation28_spill]] }
  0x1a   : > { %s1457_s5 = sld [smem:[#allocation29_spill]]  ;;  %s1131_s9 = smov [#allocation10]  }
  0x1b   : > { %p817_p11 = pnand %p816_p10, %p1207_p1  ;;  %s1132_s10 = smov [#allocation11]  }
  0x1c   : > { %s226_s11 = sshll.u32 %s1453_s2, 4  ;;  %s1133_s13 = smov [#allocation13]   ;;  %s227_s11 = int_to_ptr.hbm [resolvable:$true] %s226_s11 }
  0x1d   : > { %819 = dma.hbm_to_smem (!%p817_p11), %s227_s11, 64, %s1130_s28, [#allocation5]  }
  0x1e   : > { %s236_s15 = sshll.u32 %s1455_s3, 4  ;;  %s41_s14 = sadd.s32 1, %s1124_s25  ;;  %s237_s15 = int_to_ptr.vmem [resolvable:$true] %s236_s15 }
  0x1f   : > { %s246_s18 = sshll.u32 %s1456_s4, 4  ;;  %s50_s16 = sadd.s32 1, %s1116_s23  ;;  %s247_s18 = int_to_ptr.hbm [resolvable:$true] %s246_s18 }
  0x20   : > { %s256_s27 = sshll.u32 %s1457_s5, 4  ;;  %p43_p12 = scmp.ge.s32.totalorder %s41_s14, 2  ;;  %s257_s27 = int_to_ptr.vmem [resolvable:$true] %s256_s27 }
  0x21   : > { %822 = dma.vmem_to_smem (!%p817_p11), %s237_s15, 16, %s1131_s9, [#allocation6]  }
  0x22   : > { %825 = dma.hbm_to_smem (!%p817_p11), %s247_s18, 64, %s1132_s10, [#allocation12]  }
  0x23   : > { %828 = dma.vmem_to_smem (!%p817_p11), %s257_s27, 16, %s1133_s13, [#allocation14]  }
  0x24   : > { %p57_p13 = scmp.ne.s32.totalorder %s1116_s23, %s1112_s22  ;;  %p58_p0 = scmp.eq.s32.totalorder %s1128_s26, 0 }
  0x25   : > { %p844_p3 = scmp.lt.s32.totalorder %s1128_s26, 2  ;;  %s1470_s14 = smov (%p43_p12, %s41_s14), 0 }
  0x26   : > { %1458 = sst [smem:[#allocation24_spill]] %s1470_s14  ;;  %p1256_p5 = por %p58_p0, %p57_p13 }
  0x27   : > { %p1262_p7 = por %p1211_p2, %p57_p13  ;;  %s45_s17 = ssub.s32 %s1124_s25, %s1470_s14 }
  0x28   : > { %s267_s18 = sand.u32 1, %s1116_s23   ;;  %p48_p10 = scmp.eq.s32.totalorder %s45_s17, 0 }
  0x29   : > { %s733_s19 = sshll.u32 %s267_s18, 3  ;;  %s791_s20 = sshll.u32 %s1124_s25, 3 }
  0x2a   : > { %s1271_s27 = scalar_select %p48_p10, %s1116_s23, %s50_s16  }
  0x2b   : > { %s277_s10 = scalar_lea.hbm %s1435_s0, %s791_s20  ;;  %s271_s2 = scalar_lea.vmem [#allocation2], %s733_s19 }
  0x2c   : > { %1461 = sst [smem:[#allocation25_spill]] %s1271_s27  ;;  %s278_s13 = sshll.u32 %s277_s10, 4  ;;  %s279_s13 = int_to_ptr.hbm [resolvable:$true] %s278_s13 }
  0x2d   : > { %s280_s3 = sshll.u32 %s271_s2, 4  ;;  %p830_p2 = pnand %p844_p3, %p1256_p5  ;;  %s281_s3 = int_to_ptr.vmem [resolvable:$true] %s280_s3 }
  0x2e   : > { %s268_s30 = scalar_lea.sflag [#allocation3], %s267_s18  ;;  %s1134_s4 = smov 32  }
  0x2f   : > { %s1135_s5 = smov 2   ;;  %s300_s16 = scalar_lea.hbm %s1436_s1, %s791_s20 }
  0x30   : > { %832 = dma.hbm_to_vmem [thread:$0]  (!%p830_p2), %s279_s13, 128, %s281_s3, %s268_s30, %s1134_s4, %s1134_s4, %s1135_s5  }
  0x31   : > { %s294_s25 = scalar_lea.vmem [#allocation7], %s733_s19  ;;  %s301_s28 = sshll.u32 %s300_s16, 4  ;;  %s302_s28 = int_to_ptr.hbm [resolvable:$true] %s301_s28 }
  0x32   : > { %s303_s27 = sshll.u32 %s294_s25, 4  ;;  %s291_s9 = scalar_lea.sflag [#allocation8], %s267_s18  ;;  %s304_s27 = int_to_ptr.vmem [resolvable:$true] %s303_s27 }
  0x33   : > { %835 = dma.hbm_to_vmem [thread:$0]  (!%p830_p2), %s302_s28, 128, %s304_s27, %s291_s9, %s1134_s4, %s1134_s4, %s1135_s5  }
  0x34   : > { %315 = sbr.rel (%p1230_p8) target bundleno = 127 (0x7f), region = 44  ;;  %s1286_s2 = sand.u32 (!%p1230_p8), 1, %s1112_s22  }
  0x35   : > { %s1289_s3 = sshll.u32 (!%p1230_p8), %s1286_s2, 3  ;;  %s318_s14 = scalar_lea.sflag (!%p1230_p8), [#allocation3], %s1286_s2 }
  0x36   : > { %s1293_s11 = scalar_lea.vmem (!%p1230_p8), [#allocation2], %s1289_s3 }
  0x39   : > { %1079 = dma.done.wait (%p1217_p4), %s318_s14, 128  }
  0x3a   : > { %1081 = vsyncadd (%p1217_p4), %s318_s14, 4294967168  ;;  %s328_s4 = scalar_lea.sflag [#allocation8], %s1286_s2  ;;  %s1301_s5 = scalar_lea.vmem [#allocation7], %s1289_s3 }
  0x3b   : > { %1083 = dma.done.wait (%p1217_p4), %s328_s4, 128  }
  0x3c   : > { %1085 = vsyncadd (%p1217_p4), %s328_s4, 4294967168 }
  0x3d   : > { %1087 = dma.done.wait (%p1207_p1), [#allocation5], 64  }
  0x3e   : > { %1089 = vsyncadd (%p1207_p1), [#allocation5], 4294967232 }
  0x3f   : > { %1091 = dma.done.wait (%p1207_p1), [#allocation6], 16  }
  0x40   : > { %1093 = vsyncadd (%p1207_p1), [#allocation6], 4294967280 }
  0x41   : > { %1095 = dma.done.wait (%p1207_p1), [#allocation12], 64  }
  0x42   : > { %1097 = vsyncadd (%p1207_p1), [#allocation12], 4294967232 }
  0x43   : > { %1099 = dma.done.wait (%p1207_p1), [#allocation14], 16  }
  0x44   : > { %1101 = vsyncadd (%p1207_p1), [#allocation14], 4294967280 }
  0x45   : > { %357 = sfence }
  0x46   : > { %s395_s25 = sld [smem:[#allocation9]]  ;;  %v1324_v0 = vld [vmem:[%s1301_s5] sm:$0x3]  ;;  %v1327_v1 = vld [vmem:[%s1301_s5 + $0x2] sm:$0x3] }
  0x47   : > { %s398_s7 = sld [smem:[#allocation11]]  ;;  %v1331_v5 = vld [vmem:[%s1301_s5 + $0x4] sm:$0x3]  ;;  %v1340_v10 = vld [vmem:[%s1301_s5 + $0x6] sm:$0x3] }
  0x48   : > { %s747_s12 = sld [smem:[#allocation9 + $0x1]]  ;;  %v387_v27 = vld [vmem:[%s1293_s11] sm:$0x3]  ;;  %v388_v56 = vld [vmem:[%s1293_s11 + $0x2] sm:$0x3] }
  0x49   : > { %s748_s18 = sld [smem:[#allocation11 + $0x1]] }
  0x4a   : > { %s749_s19 = sld [smem:[#allocation9 + $0x2]] }
  0x4b   : > { %s750_s20 = sld [smem:[#allocation11 + $0x2]] }
  0x4c   : > { %v396_v2 = vstv %s395_s25  ;;  %s751_s27 = sld [smem:[#allocation9 + $0x3]] }
  0x4d   : > { %v397_v3 = vmul.f32 %v396_v2, %v1324_v0  ;;  %v399_v4 = vstv %s398_s7  ;;  %s752_s29 = sld [smem:[#allocation11 + $0x3]] }
  0x4e   : > { %v400_v6 = vmul.f32 %v399_v4, %v1324_v0  ;;  %v402_v7 = vstv %s747_s12  ;;  %s1334_s10 = sld [smem:[#allocation10]] }
  0x4f   : > { %v403_v8 = vmul.f32 %v402_v7, %v1327_v1  ;;  %v405_v9 = vstv %s748_s18  ;;  %s1337_s13 = sld [smem:[#allocation13]] }
  0x50   : > { %v406_v11 = vmul.f32 %v405_v9, %v1327_v1  ;;  %v410_v12 = vstv %s749_s19  ;;  %s753_s30 = sld [smem:[#allocation9 + $0x80]] }
  0x51   : > { %v407_v13 = vadd.f32 %v403_v8, %v397_v3  ;;  %v411_v14 = vmul.f32 %v410_v12, %v1331_v5  ;;  %v413_v15 = vstv %s750_s20  ;;  %s754_s17 = sld [smem:[#allocation11 + $0x80]]  ;;  %s1361_s20 = scalar_lea.vmem [#allocation15], %s1289_s3 }
  0x52   : > { %v408_v16 = vadd.f32 %v406_v11, %v400_v6  ;;  %v414_v17 = vmul.f32 %v413_v15, %v1331_v5  ;;  %v418_v18 = vstv %s751_s27  ;;  %s755_s16 = sld [smem:[#allocation9 + $0x81]] }
  0x53   : > { %v415_v19 = vadd.f32 %v411_v14, %v407_v13  ;;  %v419_v20 = vmul.f32 %v418_v18, %v1340_v10  ;;  %v421_v21 = vstv %s752_s29  ;;  %s756_s28 = sld [smem:[#allocation11 + $0x81]] }
  0x54   : > { %v416_v22 = vadd.f32 %v414_v17, %v408_v16  ;;  %v422_v23 = vmul.f32 %v421_v21, %v1340_v10  ;;  %v426_v24 = vstv %s1334_s10  ;;  %s757_s9 = sld [smem:[#allocation9 + $0x82]] }
  0x55   : > { %v423_v25 = vadd.f32 %v419_v20, %v415_v19  ;;  %v429_v26 = vstv %s1337_s13  ;;  %s758_s14 = sld [smem:[#allocation11 + $0x82]] }
  0x56   : > { %v424_v28 = vadd.f32 %v422_v23, %v416_v22  ;;  %v435_v29 = vstv %s753_s30  ;;  %s759_s4 = sld [smem:[#allocation9 + $0x83]] }
  0x57   : > { %v427_v30 = vadd.f32 %v426_v24, %v423_v25  ;;  %v436_v31 = vmul.f32 %v435_v29, %v1324_v0  ;;  %v438_v32 = vstv %s754_s17  ;;  %s760_s5 = sld [smem:[#allocation11 + $0x83]]  ;;  %v389_v25 = vld [vmem:[%s1293_s11 + $0x4] sm:$0x3] }
  0x58   : > { %v430_v33 = vadd.f32 %v429_v26, %v424_v28  ;;  %v439_v34 = vmul.f32 %v438_v32, %v1324_v0  ;;  %v441_v35 = vstv %s755_s16  ;;  %s1352_s25 = sld [smem:[#allocation10 + $0x1]] }
  0x59   : > { %v431_v36 = vmul.f32 %v427_v30, %v387_v27  ;;  %v442_v37 = vmul.f32 %v441_v35, %v1327_v1  ;;  %v444_v38 = vstv %s756_s28  ;;  %s1355_s7 = sld [smem:[#allocation13 + $0x1]] }
  0x5a   : > { %v445_v39 = vmul.f32 %v444_v38, %v1327_v1  ;;  %v449_v40 = vstv %s757_s9  ;;  %s764_s12 = sld [smem:[#allocation9 + $0x100]] }
  0x5b   : > { %v432_v41 = vadd.f32 %v431_v36, %v430_v33  ;;  %v446_v42 = vadd.f32 %v442_v37, %v436_v31  ;;  %v450_v43 = vmul.f32 %v449_v40, %v1331_v5  ;;  %v452_v44 = vstv %s758_s14  ;;  %s765_s18 = sld [smem:[#allocation11 + $0x100]] }
  0x5c   : > { %v447_v45 = vadd.f32 %v445_v39, %v439_v34  ;;  %v453_v46 = vmul.f32 %v452_v44, %v1331_v5  ;;  %v457_v47 = vstv %s759_s4  ;;  %s766_s19 = sld [smem:[#allocation9 + $0x101]] }
  0x5d   : > { %433 = vst [vmem:[%s1361_s20] sm:$0x3] %v432_v41  ;;  %v454_v48 = vadd.f32 %v450_v43, %v446_v42  ;;  %v458_v49 = vmul.f32 %v457_v47, %v1340_v10  ;;  %v460_v50 = vstv %s760_s5  ;;  %s767_s27 = sld [smem:[#allocation11 + $0x101]] }
  0x5e   : > { %v455_v51 = vadd.f32 %v453_v46, %v447_v45  ;;  %v461_v52 = vmul.f32 %v460_v50, %v1340_v10  ;;  %v465_v53 = vstv %s1352_s25  ;;  %s768_s29 = sld [smem:[#allocation9 + $0x102]] }
  0x5f   : > { %v462_v54 = vadd.f32 %v458_v49, %v454_v48  ;;  %v468_v55 = vstv %s1355_s7  ;;  %s769_s10 = sld [smem:[#allocation11 + $0x102]] }
  0x60   : > { %v463_v57 = vadd.f32 %v461_v52, %v455_v51  ;;  %v475_v58 = vstv %s764_s12  ;;  %s770_s3 = sld [smem:[#allocation9 + $0x103]]  ;;  %v390_v52 = vld [vmem:[%s1293_s11 + $0x6] sm:$0x3] }
  0x61   : > { %v466_v59 = vadd.f32 %v465_v53, %v462_v54  ;;  %v476_v60 = vmul.f32 %v475_v58, %v1324_v0  ;;  %v478_v61 = vstv %s765_s18  ;;  %s771_s13 = sld [smem:[#allocation11 + $0x103]] }
  0x62   : > { %v469_v62 = vadd.f32 %v468_v55, %v463_v57  ;;  %v479_v63 = vmul.f32 %v478_v61, %v1324_v0  ;;  %v481_v2 = vstv %s766_s19  ;;  %s1371_s30 = sld [smem:[#allocation10 + $0x2]]  ;;  %s793_s19 = sshll.u32 %s1120_s24, 3 }
  0x63   : > { %v470_v3 = vmul.f32 %v466_v59, %v388_v56  ;;  %v482_v4 = vmul.f32 %v481_v2, %v1327_v1  ;;  %v484_v6 = vstv %s767_s27  ;;  %s1374_s17 = sld [smem:[#allocation13 + $0x2]]  ;;  %s567_s24 = scalar_lea.hbm %s1441_s6, %s793_s19 }
  0x64   : > { %v485_v7 = vmul.f32 %v484_v6, %v1327_v1  ;;  %v489_v8 = vstv %s768_s29  ;;  %s775_s16 = sld [smem:[#allocation9 + $0x180]] }
  0x65   : > { %v471_v9 = vadd.f32 %v470_v3, %v469_v62  ;;  %v486_v11 = vadd.f32 %v482_v4, %v476_v60  ;;  %v490_v12 = vmul.f32 %v489_v8, %v1331_v5  ;;  %v492_v13 = vstv %s769_s10  ;;  %s776_s28 = sld [smem:[#allocation11 + $0x180]]  ;;  %s568_s10 = sshll.u32 %s1361_s20, 4  ;;  %s569_s10 = int_to_ptr.vmem [resolvable:$true] %s568_s10 }
  0x66   : > { %v487_v14 = vadd.f32 %v485_v7, %v479_v63  ;;  %v493_v15 = vmul.f32 %v492_v13, %v1331_v5  ;;  %v497_v16 = vstv %s770_s3  ;;  %s777_s9 = sld [smem:[#allocation9 + $0x181]]  ;;  %s570_s3 = sshll.u32 %s567_s24, 4  ;;  %s571_s3 = int_to_ptr.hbm [resolvable:$true] %s570_s3 }
  0x67   : > { %763 = vst [vmem:[%s1361_s20 + $0x2] sm:$0x3] %v471_v9  ;;  %v494_v17 = vadd.f32 %v490_v12, %v486_v11  ;;  %v498_v18 = vmul.f32 %v497_v16, %v1340_v10  ;;  %v500_v19 = vstv %s771_s13  ;;  %s778_s14 = sld [smem:[#allocation11 + $0x181]]  ;;  %s555_s13 = scalar_lea.sflag [#allocation4], %s1286_s2 }
  0x68   : > { %v495_v20 = vadd.f32 %v493_v15, %v487_v14  ;;  %v501_v21 = vmul.f32 %v500_v19, %v1340_v10  ;;  %v505_v22 = vstv %s1371_s30  ;;  %s779_s4 = sld [smem:[#allocation9 + $0x182]]  ;;  %s1040_s30 = sshra.s32 %s571_s3, 4  ;;  %s1041_s30 = int_to_ptr.hbm [resolvable:$true] %s1040_s30 }
  0x69   : > { %v502_v23 = vadd.f32 %v498_v18, %v494_v17  ;;  %v508_v24 = vstv %s1374_s17  ;;  %s780_s5 = sld [smem:[#allocation11 + $0x182]]  ;;  %s1042_s17 = scalar_lea.hbm %s1041_s30, 8 }
  0x6a   : > { %v503_v26 = vadd.f32 %v501_v21, %v495_v20  ;;  %v515_v27 = vstv %s775_s16  ;;  %s781_s25 = sld [smem:[#allocation9 + $0x183]]  ;;  %p1043_p1 = scmp.ne.s32.totalorder %s1041_s30, %s1042_s17 }
  0x6b   : > { %v506_v28 = vadd.f32 %v505_v22, %v502_v23  ;;  %v516_v29 = vmul.f32 %v515_v27, %v1324_v0  ;;  %v518_v30 = vstv %s776_s28  ;;  %s782_s7 = sld [smem:[#allocation11 + $0x183]]  ;;  %s1046_s28 = scalar_lea.hbm %s1441_s6, 16 }
  0x6c   : > { %v509_v31 = vadd.f32 %v508_v24, %v503_v26  ;;  %v519_v32 = vmul.f32 %v518_v30, %v1324_v0  ;;  %v521_v33 = vstv %s777_s9  ;;  %s783_s12 = sld [smem:[#allocation10 + $0x3]]  ;;  %p1044_p4 = pnand %p1043_p1, %p1262_p7 }
  0x6d   : > { %v510_v34 = vmul.f32 %v506_v28, %v389_v25  ;;  %v522_v35 = vmul.f32 %v521_v33, %v1327_v1  ;;  %v524_v36 = vstv %s778_s14  ;;  %s784_s18 = sld [smem:[#allocation13 + $0x3]]  ;;  %p1047_p11 = scmp.lt.s32.totalorder %s1041_s30, %s1441_s6 }
  0x6e   : > { %v525_v37 = vmul.f32 %v524_v36, %v1327_v1  ;;  %v529_v38 = vstv %s779_s4  ;;  %p1045_p8 = pneg %p1044_p4  ;;  %p1048_p12 = scmp.lt.s32.totalorder %s1046_s28, %s1042_s17 }
  0x6f   : > { %v511_v39 = vadd.f32 %v510_v34, %v509_v31  ;;  %v526_v40 = vadd.f32 %v522_v35, %v516_v29  ;;  %v530_v41 = vmul.f32 %v529_v38, %v1331_v5  ;;  %v532_v42 = vstv %s780_s5 }
  0x70   : > { %v527_v0 = vadd.f32 %v525_v37, %v519_v32  ;;  %v533_v43 = vmul.f32 %v532_v42, %v1331_v5  ;;  %v537_v44 = vstv %s781_s25  ;;  %p1049_p13 = por %p1048_p12, %p1047_p11 }
  0x71   : > { %774 = vst [vmem:[%s1361_s20 + $0x4] sm:$0x3] %v511_v39  ;;  %v534_v45 = vadd.f32 %v530_v41, %v526_v40  ;;  %v538_v46 = vmul.f32 %v537_v44, %v1340_v10  ;;  %v540_v47 = vstv %s782_s7 }
  0x72   : > { %v535_v48 = vadd.f32 %v533_v43, %v527_v0  ;;  %v541_v1 = vmul.f32 %v540_v47, %v1340_v10  ;;  %v545_v49 = vstv %s783_s12  ;;  %p1050_p0 = pnand %p1049_p13, %p1045_p8 }
  0x73   : > { %v542_v50 = vadd.f32 %v538_v46, %v534_v45  ;;  %v548_v51 = vstv %s784_s18 }
  0x74   : > { %v543_v5 = vadd.f32 %v541_v1, %v535_v48 }
  0x75   : > { %v546_v53 = vadd.f32 %v545_v49, %v542_v50 }
  0x76   : > { %v549_v54 = vadd.f32 %v548_v51, %v543_v5 }
  0x77   : > { %v550_v55 = vmul.f32 %v546_v53, %v390_v52 }
  0x79   : > { %v551_v56 = vadd.f32 %v550_v55, %v549_v54 }
  0x7b   : > { %785 = vst [vmem:[%s1361_s20 + $0x6] sm:$0x3] %v551_v56 }
  0x7c   : > { %1053 = shalt.err (!%p1050_p0)
}
  0x7d   : > { %s1136_s2 = smov 32   ;;  %s1137_s20 = smov 2  }
  0x7e   : > { %814 = dma.vmem_to_hbm [thread:$0]  (%p1262_p7), %s569_s10, 128, %s571_s3, %s555_s13, %s1136_s2, %s1136_s2, %s1137_s20  }
  0x7f PF: > { %s585_s4 = sand.u32 1, %s1108_s21   ;;  %p837_p3 = pnand %p732_p9, %p1222_p6 }
  0x80   : > { %s586_s5 = scalar_lea.sflag [#allocation4], %s585_s4 }
  0x81   : > { %p838_p5 = pneg %p837_p3 }
  0x83   : > { %1103 = dma.done.wait (%p838_p5), %s586_s5, 128  }
  0x84   : > { %1105 = vsyncadd (%p838_p5), %s586_s5, 4294967168  ;;  %s29_s26 = sadd.s32 1, %s1128_s26   ;;  %s1462_s25 = sld [smem:[#allocation25_spill]] }
  0x85   : > { %p26_p10 = scmp.ge.s32.totalorder %s29_s26, 4   ;;  %s1463_s24 = sld [smem:[#allocation23_spill]] }
  0x86   : > { %s1464_s15 = sld [smem:[#allocation24_spill]]  ;;  %s1465_s21 = smov %s1112_s22 }
  0x87   : > { %s1466_s22 = smov %s1116_s23 }
  0x88   :  { %28 = sbr.rel (!%p26_p10) target bundleno = 17 (0x11), region = 123 }
  0x8a   : > { %s1467_s23 = smov %s1462_s25 }
  0x8c   : > { %s1468_s25 = smov %s1464_s15 }
  0x8d   :  { %592 = vsyncpa [#allocation3], 1 }
  0x8e   :  { %594 = vsyncpa [#allocation3 + $0x1], 1 }
  0x8f   :  { %595 = vsyncpa [#allocation8], 1 }
  0x90   :  { %597 = vsyncpa [#allocation8 + $0x1], 1 }
  0x91   :  { %598 = vsyncpa [#allocation4], 1 }
  0x92   :  { %600 = vsyncpa [#allocation4 + $0x1], 1 }
  0x93   :  { %601 = vsyncpa [#allocation5], 1 }
  0x94   :  { %603 = vsyncpa [#allocation5 + $0x1], 1 }
  0x95   :  { %604 = vsyncpa [#allocation12], 1 }
  0x96   :  { %605 = vsyncpa [#allocation6], 1 }
  0x97   :  { %607 = vsyncpa [#allocation6 + $0x1], 1 }
  0x98   :  { %608 = vsyncpa [#allocation14], 1 }

</bundles_post_ra>
